<compile_context>
chip_gen: v6e
topology: v6e:2x2x1
jax: 0.10.0
libtpu: 0.0.40
codegen_flags: <defaults>
</compile_context>

<pallas_src>
import functools

import jax
import jax.numpy as jnp
from jax.experimental import pallas as pl
from jax.experimental.pallas import tpu as pltpu


def _max_min_kernel(pred_ref, out_ref):
    """One grid step processes a (C, TN) lane-dense tile of columns (= boxes).

    pred_ref : (C, TN)  VMEM tile, C angle predictions per box along sublanes
    out_ref  : (1, TN)  per-box max-min loss, lane-dense output slab
    """
    x = pred_ref[...].astype(jnp.float32)                      # (C, TN)
    col_max = jnp.max(x, axis=0, keepdims=True)                # (1, TN)
    col_min = jnp.min(x, axis=0, keepdims=True)                # (1, TN)
    out_ref[...] = col_max - col_min


def _round_up(x, m):
    return ((x + m - 1) // m) * m


@functools.partial(jax.jit, static_argnames=("tn",))
def _per_row_losses(pred, tn):
    """pred: [N, C]. Returns per-row max-min losses, shape [N], f32."""
    N, C = pred.shape
    Np = _round_up(N, tn)

    # Transpose to [C, N] and zero-pad the lane axis; both are fused by XLA
    # into the pallas_call's input.  Padded columns yield max-min == 0 and are
    # sliced away below, so they never contaminate the reduction.
    pred_t = jnp.transpose(pred)
    if Np > N:
        pred_t = jnp.pad(pred_t, ((0, 0), (0, Np - N)))

    per_row = pl.pallas_call(
        _max_min_kernel,
        out_shape=jax.ShapeDtypeStruct((1, Np), jnp.float32),
        grid=(Np // tn,),
        in_specs=[pl.BlockSpec((C, tn), lambda i: (0, i))],
        out_specs=pl.BlockSpec((1, tn), lambda i: (0, i)),
        compiler_params=pltpu.CompilerParams(
            dimension_semantics=("parallel",)  # no cross-step carry
        ),
    )(pred_t)
    return per_row[0, :N]


def max_min_angle_loss(pred, target=None, weight=None, avg_factor=None,
                       reduction="mean", loss_weight=1.0):
    """JAX/Pallas equivalent of MaxMinAngleLoss.forward (target is unused)."""
    assert reduction in ("none", "mean", "sum")
    pred = jnp.asarray(pred)            # keep native dtype (bf16/f32); no HBM upcast
    N, C = pred.shape

    # Lane-dense tiling: boxes along the lane axis, tile width multiple of 128.
    tn = min(2048, _round_up(N, 128))

    per_row = _per_row_losses(pred, tn=tn)                     # [N] f32

    if weight is not None:
        per_row = per_row * jnp.asarray(weight, jnp.float32).reshape(N)

    if reduction == "none":
        out = per_row
    elif reduction == "sum":
        out = jnp.sum(per_row)
    else:  # mean
        # TODO(synk): mmdet raises if avg_factor is given with non-mean
        # reduction; here avg_factor is simply ignored outside 'mean'.
        denom = jnp.float32(N) if avg_factor is None else jnp.float32(avg_factor)
        out = jnp.sum(per_row) / denom
    return loss_weight * out


class MaxMinAngleLoss:
    def __init__(self, reduction="mean", loss_weight=1.0):
        self.reduction = reduction
        self.loss_weight = loss_weight

    def __call__(self, pred, target=None, weight=None, avg_factor=None,
                 reduction_override=None, **kwargs):
        assert reduction_override in (None, "none", "mean", "sum")
        reduction = reduction_override if reduction_override else self.reduction
        return max_min_angle_loss(pred, target, weight=weight,
                                  avg_factor=avg_factor, reduction=reduction,
                                  loss_weight=self.loss_weight)


if __name__ == "__main__":
    key = jax.random.PRNGKey(0)
    k1, k2, k3 = jax.random.split(key, 3)

    # Small shapes consistent with the module: N boxes x C angle predictions.
    N, C = 16, 4
    pred = jax.random.normal(k1, (N, C), dtype=jnp.float32)
    weight = jax.random.uniform(k2, (N,), dtype=jnp.float32)

    loss_mod = MaxMinAngleLoss(reduction="mean", loss_weight=1.0)

    loss_mean = jax.block_until_ready(loss_mod(pred))
    loss_none = jax.block_until_ready(loss_mod(pred, reduction_override="none"))
    loss_wsum = jax.block_until_ready(
        loss_mod(pred, weight=weight, reduction_override="sum"))

    # pure-JAX reference check
    ref_row = jnp.max(pred, axis=1) - jnp.min(pred, axis=1)
    assert jnp.allclose(loss_mean, jnp.mean(ref_row), atol=1e-5)
    assert jnp.allclose(loss_none, ref_row, atol=1e-5)
    assert jnp.allclose(loss_wsum, jnp.sum(ref_row * weight), atol=1e-5)

    # A larger, non-multiple-of-tile case exercising multi-step grid + tail
    # padding (tn=2048 -> grid of 2 at N=3000) and a non-f32 input dtype.
    N2 = 3000
    pred2 = jax.random.normal(k3, (N2, C), dtype=jnp.bfloat16)
    out2 = jax.block_until_ready(loss_mod(pred2, reduction_override="none"))
    ref2 = (jnp.max(pred2.astype(jnp.float32), axis=1)
            - jnp.min(pred2.astype(jnp.float32), axis=1))
    assert out2.shape == (N2,)
    assert jnp.allclose(out2, ref2, atol=1e-5)

    print("KERNEL_OK")
</pallas_src>

<mosaic_0001>
module attributes {stable_mosaic.version = 11 : i64} {
  func.func @_max_min_kernel(%arg0: i32, %arg1: memref<4x128xf32, #tpu.memory_space<vmem>>, %arg2: memref<1x128xf32, #tpu.memory_space<vmem>>) attributes {dimension_semantics = [#tpu.dimension_semantics<parallel>], iteration_bounds = array<i64: 1>, scalar_prefetch = 0 : i64, scratch_operands = 0 : i64, tpu.core_type = #tpu.core_type<tc>, window_params = [{transform_indices = @transform_0, window_bounds = array<i64: 4, 128>}, {transform_indices = @transform_1, window_bounds = array<i64: 1, 128>}]} {
    %c0 = arith.constant 0 : index
    %c0_0 = arith.constant 0 : index
    %0 = vector.load %arg1[%c0, %c0_0] : memref<4x128xf32, #tpu.memory_space<vmem>>, vector<4x128xf32>
    %cst = arith.constant dense<0xFF800000> : vector<128xf32>
    %1 = vector.multi_reduction <maximumf>, %0, %cst [0] : vector<4x128xf32> to vector<128xf32>
    %2 = vector.shape_cast %1 : vector<128xf32> to vector<1x128xf32>
    %cst_1 = arith.constant dense<0x7F800000> : vector<128xf32>
    %3 = vector.multi_reduction <minimumf>, %0, %cst_1 [0] : vector<4x128xf32> to vector<128xf32>
    %4 = vector.shape_cast %3 : vector<128xf32> to vector<1x128xf32>
    %5 = arith.subf %2, %4 : vector<1x128xf32>
    %c0_2 = arith.constant 0 : index
    %c0_3 = arith.constant 0 : index
    %6 = vector.load %arg2[%c0_2, %c0_3] : memref<1x128xf32, #tpu.memory_space<vmem>>, vector<1x128xf32>
    tpu.vector_store %arg2[%c0_2, %c0_3], %5 {strides = array<i32>} : memref<1x128xf32, #tpu.memory_space<vmem>>, vector<1x128xf32>,
    return
  }
  func.func @transform_0(%arg0: i32) -> (i32, i32) {
    %c0_i32 = arith.constant 0 : i32
    %c0_i32_0 = arith.constant 0 : i32
    return %c0_i32, %arg0 : i32, i32
  }
  func.func @transform_1(%arg0: i32) -> (i32, i32) {
    %c0_i32 = arith.constant 0 : i32
    %c0_i32_0 = arith.constant 0 : i32
    return %c0_i32, %arg0 : i32, i32
  }
}

</mosaic_0001>

<bundles_post_ra>
// kernel: _per_row_losses.1
= control target key start
LH: loop header
LB: loop body
LE: loop exit
PB: predicated region body
PF: predicated region fallthrough
CT: control target
= control target key end

     0   :  { %vm9_vm0 = vcmask 1043456   ;;  %s46_s0 = inlined_call_operand.vmem [shape: f32[4,128], index: 0, kind: input, shape index: {}]   ;;  %s47_s1 = inlined_call_operand.vmem [shape: f32[1,128], index: 1, kind: output, shape index: {}]  }
   0x1   :  { %v8_v0 = vld [vmem:[%s46_s0] sm:$0xf] }
   0x2   :  { %v10_v1 = vsel %vm9_vm0, %v8_v0, -inf  ;;  %v17_v2 = vsel %vm9_vm0, %v8_v0, inf }
   0x3   :  { %v11_v3 = vrot.slane %v10_v1, 4  ;;  %v18_v4 = vrot.slane %v17_v2, 4 }
   0x5   :  { %v12_v5 = vmax.f32 %v10_v1, %v11_v3  ;;  %v19_v6 = vmin.f32 %v17_v2, %v18_v4 }
   0x7   :  { %v13_v7 = vrot.slane %v12_v5, 2  ;;  %v20_v8 = vrot.slane %v19_v6, 2 }
   0x9   :  { %v14_v9 = vmax.f32 %v12_v5, %v13_v7  ;;  %v21_v10 = vmin.f32 %v19_v6, %v20_v8 }
   0xb   :  { %v15_v11 = vrot.slane %v14_v9, 1  ;;  %v22_v12 = vrot.slane %v21_v10, 1 }
   0xd   :  { %v16_v13 = vmax.f32 %v14_v9, %v15_v11  ;;  %v23_v14 = vmin.f32 %v21_v10, %v22_v12 }
   0xf   :  { %v24_v15 = vsub.f32 %v16_v13, %v23_v14 }
  0x11   :  { %25 = vst [vmem:[%s47_s1] sm:$0x1] %v24_v15 }

</bundles_post_ra>
